<compile_context>
chip_gen: v5e
topology: v5e:2x2
jax: 0.10.0
libtpu: 0.0.40
codegen_flags: <defaults>
</compile_context>

<pallas_src>
import functools

import jax
import jax.numpy as jnp
from jax.experimental import pallas as pl
from jax.experimental.pallas import tpu as pltpu


_LANE = 128
_FALLBACK_VMEM_CAP_BYTES = 64 * 1024 * 1024   # v7x floor; v5e/v6e have 128 MiB
_MAX_ROW_TILE = 2048


def _round_up(v: int, m: int) -> int:
    return (v + m - 1) // m * m


def _vmem_capacity_bytes() -> int:
    try:
        return int(pltpu.get_tpu_info().vmem_capacity_bytes)
    except Exception:
        return _FALLBACK_VMEM_CAP_BYTES


def _use_low_precision_scale(dtype) -> bool:
    # Packed-bf16 scale pass only on v7x-class parts (bf16 VALU, and per-core
    # HBM bandwidth high enough that f32 VPU work would bind first). Keep the
    # f32 path on v5e (no bf16 VALU) and v6e (already HBM-bound).
    if jnp.dtype(dtype) != jnp.dtype(jnp.bfloat16):
        return False
    try:
        kind = jax.devices()[0].device_kind.lower()
    except Exception:
        return False
    return any(f"v{v}" in kind for v in (7, 8, 9))


def _rmsnorm_kernel(x_ref, w_ref, o_ref, *, eps: float, inv_d: float):
    # Sum of squares in f32 (matches x.float().pow(2).mean(-1)), rsqrt on the
    # EUP, then a scale pass in the weight's dtype (f32 everywhere except the
    # packed-bf16 v7x path). The f32 upcast is not kept live for the scale
    # pass on the bf16 path.
    x = x_ref[...]                                            # (tm, D)
    xf = x.astype(jnp.float32)
    ss = jnp.sum(xf * xf, axis=-1, keepdims=True)             # (tm, 1) f32
    inv = jax.lax.rsqrt(ss * inv_d + eps)                     # (tm, 1) f32
    w = w_ref[...]                                            # (1, D)
    sd = w.dtype
    o_ref[...] = (x.astype(sd) * inv.astype(sd) * w).astype(o_ref.dtype)


def rmsnorm(x: jax.Array, weight: jax.Array, eps: float = 1e-6) -> jax.Array:
    """RMSNorm over the last axis of x, matching the PyTorch reference."""
    orig_shape = x.shape
    D = orig_shape[-1]
    x2d = x.reshape(-1, D)
    N = x2d.shape[0]

    itemsize = jnp.dtype(x.dtype).itemsize
    # Sublane packing: 8 rows (f32), 16 (bf16), 32 (int8/fp8).
    pack = max(8, 32 // max(itemsize, 1))

    # Hardware-derived VMEM budget. Physical lane footprint of a row is padded
    # up to a multiple of 128 lanes inside VMEM even though blocks are (tm, D).
    dp_lanes = _round_up(D, _LANE)
    vmem_cap = _vmem_capacity_bytes()
    vmem_limit = int(vmem_cap * 0.7)
    weight_bytes = 2 * dp_lanes * 4                     # fixed, double-buffered
    tile_budget = max(vmem_limit // 2 - weight_bytes, 1 << 20)
    # Per element: input + output, double-buffered, plus ~8 B f32 intermediates.
    bytes_per_row = dp_lanes * (4 * itemsize + 8)

    tm = max(pack, tile_budget // bytes_per_row)
    tm = min(tm, _MAX_ROW_TILE)
    # Megacore (v7x): keep >= 8 evenly sized grid steps when N allows.
    tm = min(tm, max(pack, _round_up(pl.cdiv(N, 8), pack)))
    tm = max(pack, (tm // pack) * pack)

    num_steps = pl.cdiv(N, tm)

    # Scale-pass dtype (f32 path or packed-bf16 v7x path); weight is tiny, so
    # casting it once in the wrapper is free.
    scale_dtype = x.dtype if _use_low_precision_scale(x.dtype) else jnp.float32
    w2d = weight.reshape(1, D).astype(scale_dtype)

    # Deep-buffer the x stream only for small tiles with enough grid steps;
    # large tiles already sit near the HBM roofline with double buffering.
    x_tile_bytes = tm * dp_lanes * itemsize
    if x_tile_bytes < (1 << 20) and num_steps >= 4:
        x_spec = pl.BlockSpec((tm, D), lambda i: (i, 0),
                              pipeline_mode=pl.Buffered(3))
    else:
        x_spec = pl.BlockSpec((tm, D), lambda i: (i, 0))

    # TODO(synk): if tiny hidden dims (D << 128) matter in production, pack
    # 128 // D rows per lane row with a segmented reduction instead of issuing
    # mostly-dead lanes.
    out = pl.pallas_call(
        functools.partial(_rmsnorm_kernel, eps=float(eps), inv_d=1.0 / D),
        out_shape=jax.ShapeDtypeStruct((N, D), x.dtype),
        grid_spec=pltpu.PrefetchScalarGridSpec(
            num_scalar_prefetch=0,
            grid=(num_steps,),
            in_specs=[
                x_spec,
                # Weight: constant block index -> not re-DMA'd per step.
                pl.BlockSpec((1, D), lambda i: (0, 0)),
            ],
            out_specs=pl.BlockSpec((tm, D), lambda i: (i, 0)),
        ),
        compiler_params=pltpu.CompilerParams(
            dimension_semantics=("parallel",),
            vmem_limit_bytes=vmem_limit,
        ),
    )(x2d, w2d)

    return out.reshape(orig_shape)


def rmsnorm_reference(x, weight, eps=1e-6):
    xf = x.astype(jnp.float32)
    out = xf * jax.lax.rsqrt(jnp.mean(xf * xf, axis=-1, keepdims=True) + eps)
    return (weight.astype(jnp.float32) * out).astype(x.dtype)


if __name__ == "__main__":
    key = jax.random.PRNGKey(0)
    batch, seq, hidden = 2, 8, 32

    # Deterministic parameter init: nn.Parameter(torch.ones(dim))
    weight = jnp.ones((hidden,), dtype=jnp.float32)

    x = jax.random.normal(key, (batch, seq, hidden), dtype=jnp.bfloat16)

    y = rmsnorm(x, weight, eps=1e-6)
    y = jax.block_until_ready(y)

    y_ref = rmsnorm_reference(x, weight, eps=1e-6)
    assert y.shape == x.shape and y.dtype == x.dtype
    assert jnp.allclose(y.astype(jnp.float32), y_ref.astype(jnp.float32),
                        atol=1e-2, rtol=1e-2)

    print("KERNEL_OK")
</pallas_src>

<mosaic_0001>
module attributes {stable_mosaic.version = 11 : i64} {
  func.func @_rmsnorm_kernel(%arg0: i32, %arg1: memref<16x32xbf16, #tpu.memory_space<vmem>>, %arg2: memref<1x32xf32, #tpu.memory_space<vmem>>, %arg3: memref<16x32xbf16, #tpu.memory_space<vmem>>) attributes {dimension_semantics = [#tpu.dimension_semantics<parallel>], iteration_bounds = array<i64: 1>, scalar_prefetch = 0 : i64, scratch_operands = 0 : i64, tpu.core_type = #tpu.core_type<tc>, window_params = [{transform_indices = @transform_0, window_bounds = array<i64: 16, 32>}, {pipeline_mode = #tpu.pipeline_mode<synchronous>, transform_indices = @transform_1, window_bounds = array<i64: 1, 32>}, {transform_indices = @transform_2, window_bounds = array<i64: 16, 32>}]} {
    %c0 = arith.constant 0 : index
    %c0_0 = arith.constant 0 : index
    %0 = vector.load %arg1[%c0, %c0_0] : memref<16x32xbf16, #tpu.memory_space<vmem>>, vector<16x32xbf16>
    %1 = arith.extf %0 : vector<16x32xbf16> to vector<16x32xf32>
    %2 = arith.mulf %1, %1 : vector<16x32xf32>
    %cst = arith.constant dense<0.000000e+00> : vector<16xf32>
    %3 = vector.multi_reduction <add>, %2, %cst [1] : vector<16x32xf32> to vector<16xf32>
    %4 = vector.shape_cast %3 : vector<16xf32> to vector<16x1xf32>
    %cst_1 = arith.constant 3.125000e-02 : f32
    %5 = vector.broadcast %cst_1 : f32 to vector<16x1xf32>
    %6 = arith.mulf %4, %5 : vector<16x1xf32>
    %cst_2 = arith.constant 9.99999997E-7 : f32
    %7 = vector.broadcast %cst_2 : f32 to vector<16x1xf32>
    %8 = arith.addf %6, %7 : vector<16x1xf32>
    %9 = math.rsqrt %8 : vector<16x1xf32>
    %c0_3 = arith.constant 0 : index
    %c0_4 = arith.constant 0 : index
    %10 = vector.load %arg2[%c0_3, %c0_4] : memref<1x32xf32, #tpu.memory_space<vmem>>, vector<1x32xf32>
    %11 = arith.extf %0 : vector<16x32xbf16> to vector<16x32xf32>
    %12 = vector.broadcast %9 : vector<16x1xf32> to vector<16x32xf32>
    %13 = arith.mulf %11, %12 : vector<16x32xf32>
    %14 = vector.broadcast %10 : vector<1x32xf32> to vector<16x32xf32>
    %15 = arith.mulf %13, %14 : vector<16x32xf32>
    %16 = arith.truncf %15 : vector<16x32xf32> to vector<16x32xbf16>
    %c0_5 = arith.constant 0 : index
    %c0_6 = arith.constant 0 : index
    %17 = vector.load %arg3[%c0_5, %c0_6] : memref<16x32xbf16, #tpu.memory_space<vmem>>, vector<16x32xbf16>
    tpu.vector_store %arg3[%c0_5, %c0_6], %16 {strides = array<i32>} : memref<16x32xbf16, #tpu.memory_space<vmem>>, vector<16x32xbf16>,
    return
  }
  func.func @transform_0(%arg0: i32) -> (i32, i32) {
    %c0_i32 = arith.constant 0 : i32
    %c0_i32_0 = arith.constant 0 : i32
    return %arg0, %c0_i32 : i32, i32
  }
  func.func @transform_1(%arg0: i32) -> (i32, i32) {
    %c0_i32 = arith.constant 0 : i32
    %c0_i32_0 = arith.constant 0 : i32
    %c0_i32_1 = arith.constant 0 : i32
    return %c0_i32, %c0_i32_0 : i32, i32
  }
  func.func @transform_2(%arg0: i32) -> (i32, i32) {
    %c0_i32 = arith.constant 0 : i32
    %c0_i32_0 = arith.constant 0 : i32
    return %arg0, %c0_i32 : i32, i32
  }
}

</mosaic_0001>

<bundles_post_ra>
// kernel: tpu_custom_call.1
= control target key start
LH: loop header
LB: loop body
LE: loop exit
PB: predicated region body
PF: predicated region fallthrough
CT: control target
= control target key end

     0   :  { %7 = vsyncpa [#allocation3], 0  ;;  %s239_s0 = inlined_call_operand.hbm [shape: bf16[16,32], index: 0, kind: input, shape index: {}]   ;;  %s240_s1 = inlined_call_operand.hbm [shape: f32[1,32], index: 1, kind: input, shape index: {}]   ;;  %s241_s2 = inlined_call_operand.hbm [shape: bf16[16,32], index: 2, kind: output, shape index: {}]  }
   0x1   :  { %8 = vsyncpa [#allocation6], 0 }
   0x2   :  { %9 = vsyncpa [#allocation4], 0  ;;  %s14_s11 = sshll.u32 %s239_s0, 4  ;;  %s204_s12 = smov [#allocation2]   ;;  %s15_s11 = int_to_ptr.hbm [resolvable:$true] %s14_s11 }
   0x3   :  { %s16_s13 = sshll.u32 %s204_s12, 4  ;;  %s28_s16 = sshll.u32 %s240_s1, 4  ;;  %s17_s13 = int_to_ptr.vmem [resolvable:$true] %s16_s13  ;;  %s29_s16 = int_to_ptr.hbm [resolvable:$true] %s28_s16 }
   0x4   :  { %s205_s17 = smov 64   ;;  %s206_s18 = smov 4  }
   0x5   :  { %22 = dma.hbm_to_vmem [thread:$0]  %s15_s11, 128, %s17_s13, [#allocation3], %s205_s17, %s205_s17, %s206_s18  }
   0x6   :  { %s207_s19 = smov [#allocation5]  }
   0x7   :  { %s30_s20 = sshll.u32 %s207_s19, 4  ;;  %s31_s20 = int_to_ptr.vmem [resolvable:$true] %s30_s20 }
   0x8   :  { %33 = dma.hbm_to_vmem [thread:$0]  %s29_s16, 16, %s31_s20, [#allocation6]  }
   0x9   :  { %198 = dma.done.wait [#allocation3], 128  }
   0xa   :  { %199 = vsyncadd [#allocation3], 4294967168 }
   0xb   :  { %200 = dma.done.wait [#allocation6], 16  }
   0xc   :  { %201 = vsyncadd [#allocation6], 4294967280  ;;  %v113_v0 = vld [vmem:[#allocation2] sm:$0xff]   ;;  %vm48_vm0 = vcmask 261120   ;;  %v121_v21 = vld [vmem:[#allocation5] ss:$0 sm:$0xff] }
   0xd   :  { %v114_v1 = vunpack.c.l.bf16 %v113_v0  ;;  %v115_v3 = vunpack.c.h.bf16 %v113_v0  ;;  %vm89_vm5 = vcmask 257024   ;;  %s208_s0 = smov [#allocation7]   ;;  %s98_s23 = sshll.u32 %s241_s2, 4  ;;  %s99_s23 = int_to_ptr.hbm [resolvable:$true] %s98_s23 }
   0xe   :  { %s96_s1 = sshll.u32 %s208_s0, 4  ;;  %s97_s1 = int_to_ptr.vmem [resolvable:$true] %s96_s1 }
   0xf   :  { %v46_v2 = vmul.f32 %v114_v1, %v114_v1  ;;  %v47_v5 = vmul.f32 %v115_v3, %v115_v3 }
  0x11   :  { %v49_v4 = vsel %vm48_vm0, %v46_v2, 0.0  ;;  %v52_v6 = vsel %vm48_vm0, %v47_v5, 0.0 }
  0x12   :  { %50 = vadd.xlane.f32.xlu0 %v49_v4 }
  0x1a   :  { %53 = vadd.xlane.f32.xlu0 %v52_v6 }
  0x85   :  { %v51_v7 = vpop.xlane.xlu0 %50 }
  0x86   :  { %v55_v8 = vmul.f32 0.03125, %v51_v7 }
  0x88   :  { %v57_v9 = vadd.f32 1e-06, %v55_v8 }
  0x8a   :  { %122 = vrsqrt.f32 %v57_v9  ;;  %vm65_vm2 = vweird.f32 %v57_v9 }
  0x8d   :  { %v54_v10 = vpop.xlane.xlu0 %53 }
  0x8e   :  { %v56_v11 = vmul.f32 0.03125, %v54_v10 }
  0x90   :  { %v123_v12 = vpop.eup %122  ;;  %v58_v13 = vadd.f32 1e-06, %v56_v11 }
  0x91   :  { %v60_v14 = vmul.f32 %v123_v12, %v57_v9  ;;  %vm66_vm1 = vweird.f32 %v123_v12 }
  0x92   :  { %124 = vrsqrt.f32 %v58_v13  ;;  %vm67_vm3 = vmor %vm65_vm2, %vm66_vm1  ;;  %vm75_vm6 = vweird.f32 %v58_v13 }
  0x93   :  { %v61_v15 = vmul.f32 %v123_v12, %v60_v14 }
  0x95   :  { %v62_v16 = vmul.f32 0.5, %v61_v15 }
  0x97   :  { %v63_v17 = vsub.f32 1.5, %v62_v16 }
  0x98   :  { %v125_v18 = vpop.eup %124 }
  0x99   :  { %v64_v19 = vmul.f32 %v123_v12, %v63_v17  ;;  %v70_v20 = vmul.f32 %v125_v18, %v58_v13  ;;  %vm76_vm4 = vweird.f32 %v125_v18 }
  0x9a   :  { %vm77_vm7 = vmor %vm75_vm6, %vm76_vm4 }
  0x9b   :  { %v68_v22 = vsel %vm67_vm3, %v123_v12, %v64_v19  ;;  %v71_v23 = vmul.f32 %v125_v18, %v70_v20 }
  0x9c   :  { %v80_v24 = vmul.f32 %v114_v1, %v68_v22 }
  0x9d   :  { %v72_v25 = vmul.f32 0.5, %v71_v23 }
  0x9e   :  { %v85_v26 = vmul.f32 %v121_v21, %v80_v24 }
  0x9f   :  { %v73_v27 = vsub.f32 1.5, %v72_v25 }
  0xa0   :  { %v87_v28 = vpack.c.bf16 %v85_v26, %v85_v26 }
  0xa1   :  { %v74_v29 = vmul.f32 %v125_v18, %v73_v27 }
  0xa2   :  { %90 = vst.msk [vmem:[#allocation7] sm:$0xf] %vm89_vm5, %v87_v28 }
  0xa3   :  { %v78_v30 = vsel %vm77_vm7, %v125_v18, %v74_v29 }
  0xa4   :  { %v81_v31 = vmul.f32 %v115_v3, %v78_v30 }
  0xa6   :  { %v86_v32 = vmul.f32 %v121_v21, %v81_v31 }
  0xa8   :  { %v88_v33 = vpack.c.bf16 %v86_v32, %v86_v32 }
  0xaa   :  { %91 = vst.msk [vmem:[#allocation7 + $0x4] sm:$0xf] %vm89_vm5, %v88_v33 }
  0xab   :  { %104 = dma.vmem_to_hbm [thread:$0]  %s97_s1, 128, %s99_s23, [#allocation4], %s205_s17, %s205_s17, %s206_s18  }
  0xac   :  { %202 = dma.done.wait [#allocation4], 128  }
  0xad   :  { %203 = vsyncadd [#allocation4], 4294967168 }
  0xae   :  { %109 = vsyncpa [#allocation3], 1 }
  0xaf   :  { %110 = vsyncpa [#allocation6], 1 }
  0xb0   :  { %111 = vsyncpa [#allocation4], 1 }

</bundles_post_ra>
